<compile_context>
chip_gen: v6e
topology: v6e:2x2x1
jax: 0.10.0
libtpu: 0.0.40
codegen_flags: <defaults>
</compile_context>

<pallas_src>
import functools
import math

import jax
import jax.numpy as jnp
from jax.experimental import pallas as pl
from jax.experimental.pallas import tpu as pltpu

EPS = 1e-6


# --------------------------- hardware-aware sizing ---------------------------

def _tpu_vmem_bytes():
    try:
        return int(pltpu.get_tpu_info().vmem_capacity_bytes)
    except Exception:
        return 64 * 1024 * 1024            # conservative (v7x-sized) fallback


_VMEM_BYTES = _tpu_vmem_bytes()
_VMEM_LIMIT = min(_VMEM_BYTES * 3 // 4, 96 * 1024 * 1024)

# Single tile config for all generations:
#   matmul worst case (x 512x1024 bf16 + w 1024x512 bf16 + residual/out 512x512
#   f32, double-buffered, + f32 acc) is ~9 MiB -> fits v7x's 48 MiB scoped budget
#   with room to spare; tm=512 keeps weight-stream arithmetic intensity above the
#   ~600-650 flop/byte needed to stay MXU-bound on v6e/v7x.
#   flash working set at tq=256, tk=512, Dh=128 is < 1.5 MiB, so no v7x halving.
_TM, _TN, _TK = 512, 512, 1024
_TQS, _TKS = 256, 512


def _pick(dim, target, align):
    """Largest tile <= target that divides dim and is a multiple of align.
    Falls back to the full dim (block == array extent is always legal).
    NOTE: for awkward (non-divisible) real-model dims, pad the array instead of
    relying on this fallback, or a single huge block may exceed VMEM."""
    if dim <= target or dim % align != 0:
        return dim
    t = (target // align) * align
    while t >= align:
        if dim % t == 0:
            return t
        t -= align
    return dim


def _cparams(semantics):
    return pltpu.CompilerParams(dimension_semantics=semantics,
                                vmem_limit_bytes=_VMEM_LIMIT)


# ------------------------- matmul (+bias/act/gate/residual) -------------------

def _matmul_kernel(x_ref, w_ref, b_ref, *rest, activation, has_gate, has_res):
    rest = list(rest)
    gate_ref = rest.pop(0) if has_gate else None
    res_ref = rest.pop(0) if has_res else None
    o_ref, acc_ref = rest
    k_idx = pl.program_id(3)

    @pl.when(k_idx == 0)
    def _():
        acc_ref[...] = jnp.zeros_like(acc_ref)

    # bf16 MXU inputs, f32 accumulation in VMEM scratch.
    acc_ref[...] += jnp.dot(x_ref[0], w_ref[...],
                            preferred_element_type=jnp.float32)

    @pl.when(k_idx == pl.num_programs(3) - 1)
    def _():
        y = acc_ref[...] + b_ref[...]
        if activation == "gelu":                       # fused FFN activation
            y = jax.nn.gelu(y, approximate=True)
        if has_gate:                                   # fused adaLN gate
            y = y * gate_ref[0]
        if has_res:                                    # fused residual add (f32)
            y = res_ref[0] + y
        o_ref[0] = y.astype(o_ref.dtype)


def matmul_bias(x, w, b, *, activation=None, gate=None, residual=None,
                out_dtype=jnp.float32):
    """Tiled  y = residual + act(x @ w + b) * gate  over [B, S, K] activations."""
    B, S, K = x.shape
    N = w.shape[-1]
    x3 = x.astype(jnp.bfloat16)
    w2 = w.astype(jnp.bfloat16)
    b2 = b.reshape(1, N).astype(jnp.float32)

    tm = _pick(S, _TM, 8)
    tn = _pick(N, _TN, 128)
    tk = _pick(K, _TK, 128)
    grid = (B, S // tm, N // tn, K // tk)

    inputs = [x3, w2, b2]
    in_specs = [
        pl.BlockSpec((1, tm, tk), lambda bb, i, j, k: (bb, i, k)),
        pl.BlockSpec((tk, tn), lambda bb, i, j, k: (k, j)),
        pl.BlockSpec((1, tn), lambda bb, i, j, k: (0, j)),
    ]
    if gate is not None:
        inputs.append(gate.reshape(B, 1, N).astype(jnp.float32))
        in_specs.append(pl.BlockSpec((1, 1, tn), lambda bb, i, j, k: (bb, 0, j)))
    if residual is not None:
        inputs.append(residual.astype(jnp.float32))
        in_specs.append(pl.BlockSpec((1, tm, tn), lambda bb, i, j, k: (bb, i, j)))

    return pl.pallas_call(
        functools.partial(_matmul_kernel, activation=activation,
                          has_gate=gate is not None, has_res=residual is not None),
        out_shape=jax.ShapeDtypeStruct((B, S, N), out_dtype),
        grid_spec=pltpu.PrefetchScalarGridSpec(
            num_scalar_prefetch=0, grid=grid,
            in_specs=in_specs,
            out_specs=pl.BlockSpec((1, tm, tn), lambda bb, i, j, k: (bb, i, j)),
            scratch_shapes=[pltpu.VMEM((tm, tn), jnp.float32)]),
        compiler_params=_cparams(("parallel", "parallel", "parallel", "arbitrary")),
    )(*inputs)


# ------------------------ LayerNorm + adaLN modulation ------------------------

def _ln_mod_kernel(x_ref, scale_ref, shift_ref, o_ref, *, eps):
    x = x_ref[0].astype(jnp.float32)                   # (ts, D)
    mu = jnp.mean(x, axis=-1, keepdims=True)
    xc = x - mu
    var = jnp.mean(xc * xc, axis=-1, keepdims=True)
    y = xc * jax.lax.rsqrt(var + eps)
    o_ref[0] = (y * (1.0 + scale_ref[0]) + shift_ref[0]).astype(o_ref.dtype)


def layernorm_modulate(x, scale, shift, eps=EPS):
    """FP32 LayerNorm (no affine) over D, then *(1+scale)+shift; bf16 output."""
    B, S, D = x.shape
    ts = _pick(S, _TM, 8)
    return pl.pallas_call(
        functools.partial(_ln_mod_kernel, eps=eps),
        out_shape=jax.ShapeDtypeStruct((B, S, D), jnp.bfloat16),
        grid=(B, S // ts),
        in_specs=[pl.BlockSpec((1, ts, D), lambda b, s: (b, s, 0)),
                  pl.BlockSpec((1, 1, D), lambda b, s: (b, 0, 0)),
                  pl.BlockSpec((1, 1, D), lambda b, s: (b, 0, 0))],
        out_specs=pl.BlockSpec((1, ts, D), lambda b, s: (b, s, 0)),
        compiler_params=_cparams(("parallel", "parallel")),
    )(x, scale, shift)


# ------------------ q/k prep: RMSNorm + rotary + scale (fused) ----------------

def _qk_prep_kernel(x_ref, *rest, eps, use_rope):
    if use_rope:
        xs_ref, cw_ref, sw_ref, o_ref = rest
    else:
        cw_ref, o_ref = rest
    x = x_ref[0].astype(jnp.float32)                   # (ts, D)
    r = jax.lax.rsqrt(jnp.mean(x * x, axis=-1, keepdims=True) + eps)
    if use_rope:
        # interleaved-pair rotary expressed with a precomputed signed pair-swap of x
        # (pure VPU work; rms weight & 1/sqrt(Dh) already folded into cw/sw tables).
        y = x * cw_ref[...] + xs_ref[0].astype(jnp.float32) * sw_ref[...]
    else:
        y = x * cw_ref[...]
    o_ref[0] = (y * r).astype(o_ref.dtype)


def qk_prep(x, rms_w, *, rope=None, scale=1.0, eps=EPS):
    """Across-heads RMSNorm (+ optional rotary) + scale on [B, S, D]; bf16 out."""
    B, S, D = x.shape
    ts = _pick(S, _TQS, 8)
    w = rms_w.astype(jnp.float32).reshape(1, D)
    xb = x.astype(jnp.bfloat16)

    if rope is None:
        inputs = [xb, w * scale]
        in_specs = [pl.BlockSpec((1, ts, D), lambda b, s: (b, s, 0)),
                    pl.BlockSpec((1, D), lambda b, s: (0, 0))]
        use_rope = False
    else:
        cos_f, sin_f = rope                            # [S, D] each, per-head tiled
        # fold rms weight and scale into the tables (cw for x, sw for swapped x)
        cw = (cos_f * w * scale).astype(jnp.float32)
        w_sw = w.reshape(1, D // 2, 2)[:, :, ::-1].reshape(1, D)
        sw = (sin_f * w_sw * scale).astype(jnp.float32)
        # signed pair swap of x computed once in XLA: xs[2i] = -x[2i+1], xs[2i+1] = x[2i]
        xp = xb.reshape(B, S, D // 2, 2)
        x_sw = jnp.stack([-xp[..., 1], xp[..., 0]], axis=-1).reshape(B, S, D)
        inputs = [xb, x_sw, cw, sw]
        in_specs = [pl.BlockSpec((1, ts, D), lambda b, s: (b, s, 0)),
                    pl.BlockSpec((1, ts, D), lambda b, s: (b, s, 0)),
                    pl.BlockSpec((ts, D), lambda b, s: (s, 0)),
                    pl.BlockSpec((ts, D), lambda b, s: (s, 0))]
        use_rope = True

    return pl.pallas_call(
        functools.partial(_qk_prep_kernel, eps=eps, use_rope=use_rope),
        out_shape=jax.ShapeDtypeStruct((B, S, D), jnp.bfloat16),
        grid=(B, S // ts),
        in_specs=in_specs,
        out_specs=pl.BlockSpec((1, ts, D), lambda b, s: (b, s, 0)),
        compiler_params=_cparams(("parallel", "parallel")),
    )(*inputs)


# ------------------------------- flash attention ------------------------------

def _flash_kernel(q_ref, k_ref, v_ref, o_ref, m_sc, l_sc, acc_sc):
    ki = pl.program_id(2)

    @pl.when(ki == 0)
    def _():
        m_sc[...] = jnp.full_like(m_sc, -jnp.inf)
        l_sc[...] = jnp.zeros_like(l_sc)
        acc_sc[...] = jnp.zeros_like(acc_sc)

    # q/k arrive pre-normalized, pre-rotated and pre-scaled (bf16) -> lean inner loop.
    s = jax.lax.dot_general(q_ref[0], k_ref[0], (((1,), (1,)), ((), ())),
                            preferred_element_type=jnp.float32)       # (tq, tk)

    m_prev = m_sc[...]
    m_new = jnp.maximum(m_prev, jnp.max(s, axis=-1, keepdims=True))
    alpha = jnp.exp(m_prev - m_new)
    # TODO(synk): on v6e/v7x the exp could run in bf16 (bf16 EUP); kept f32 for v5e parity.
    p = jnp.exp(s - m_new)
    l_sc[...] = alpha * l_sc[...] + jnp.sum(p, axis=-1, keepdims=True)
    acc_sc[...] = alpha * acc_sc[...] + jnp.dot(
        p.astype(jnp.bfloat16), v_ref[0], preferred_element_type=jnp.float32)
    m_sc[...] = m_new

    @pl.when(ki == pl.num_programs(2) - 1)
    def _():
        o_ref[0] = (acc_sc[...] * pl.reciprocal(l_sc[...], approx=False)
                    ).astype(o_ref.dtype)


def flash_sdpa(q, k, v):
    """q: [BH, Sq, Dh] bf16, k/v: [BH, Sk, Dh] bf16 -> [BH, Sq, Dh] bf16."""
    BH, Sq, Dh = q.shape
    Sk = k.shape[1]
    tq = _pick(Sq, _TQS, 8)
    tk = _pick(Sk, _TKS, 8)
    return pl.pallas_call(
        _flash_kernel,
        out_shape=jax.ShapeDtypeStruct((BH, Sq, Dh), jnp.bfloat16),
        grid_spec=pltpu.PrefetchScalarGridSpec(
            num_scalar_prefetch=0, grid=(BH, Sq // tq, Sk // tk),
            in_specs=[pl.BlockSpec((1, tq, Dh), lambda bh, qi, ki: (bh, qi, 0)),
                      pl.BlockSpec((1, tk, Dh), lambda bh, qi, ki: (bh, ki, 0)),
                      pl.BlockSpec((1, tk, Dh), lambda bh, qi, ki: (bh, ki, 0))],
            out_specs=pl.BlockSpec((1, tq, Dh), lambda bh, qi, ki: (bh, qi, 0)),
            scratch_shapes=[pltpu.VMEM((tq, 1), jnp.float32),
                            pltpu.VMEM((tq, 1), jnp.float32),
                            pltpu.VMEM((tq, Dh), jnp.float32)]),
        compiler_params=_cparams(("parallel", "parallel", "arbitrary")),
    )(q, k, v)


# -------------------------- attention / block assembly ------------------------

def pallas_attention(x, enc, p, num_heads, *, rope=None, residual=None,
                     out_dtype=jnp.bfloat16):
    B, Sq, D = x.shape
    Sk = enc.shape[1]
    Dh = D // num_heads
    scale = 1.0 / math.sqrt(Dh)

    q = matmul_bias(x, p["wq"], p["bq"], out_dtype=jnp.bfloat16)
    k = matmul_bias(enc, p["wk"], p["bk"], out_dtype=jnp.bfloat16)
    v = matmul_bias(enc, p["wv"], p["bv"], out_dtype=jnp.bfloat16)
    q = qk_prep(q, p["norm_q"], rope=rope, scale=scale)   # RMS + rotary + 1/sqrt(Dh)
    k = qk_prep(k, p["norm_k"], rope=rope, scale=1.0)     # RMS + rotary

    # TODO(synk): for real Wan (Dh=128) fold the head split/merge into the flash
    # BlockSpec index_map (view q/k/v as [B, S, H, Dh]) to drop these XLA transposes.
    def split(t, S):
        return t.reshape(B, S, num_heads, Dh).transpose(0, 2, 1, 3).reshape(
            B * num_heads, S, Dh)

    o = flash_sdpa(split(q, Sq), split(k, Sk), split(v, Sk))
    o = o.reshape(B, num_heads, Sq, Dh).transpose(0, 2, 1, 3).reshape(B, Sq, D)
    # residual (if given) is fused into the out-projection epilogue.
    return matmul_bias(o, p["wo"], p["bo"], residual=residual, out_dtype=out_dtype)


def wan_block_pallas(params, hidden, encoder, temb, rotary,
                     temb_cond, hidden_cond, temb_kf, hidden_kf, num_heads):
    B, S1, D = hidden.shape
    S2 = hidden_cond.shape[1]
    H = num_heads
    Dh = D // H
    sst = params["scale_shift_table"]

    def chunk6(t):
        m = sst + t.astype(jnp.float32)                 # [B, 6, D]
        return [m[:, i:i + 1, :] for i in range(6)]

    sh_m, sc_m, g_m, csh_m, csc_m, cg_m = chunk6(temb)
    sh_c, sc_c, g_c, csh_c, csc_c, cg_c = chunk6(temb_cond)
    sh_k, sc_k, g_k, csh_k, csc_k, cg_k = chunk6(temb_kf)

    # --- self-attention over the concatenated (main | cond | keyframe) sequence ---
    n_main = layernorm_modulate(hidden, sc_m, sh_m)
    n_cond = layernorm_modulate(hidden_cond, sc_c, sh_c)
    n_kf = layernorm_modulate(hidden_kf, sc_k, sh_k)
    # TODO(synk): write the three LN outputs straight into one slab via an offset
    # output index_map to avoid this (bf16) concat copy.
    norm_cat = jnp.concatenate([n_main, n_cond, n_kf], axis=1)

    cos_h, sin_h = rotary                               # [S_total, Dh//2]
    cos_full = jnp.tile(jnp.repeat(cos_h, 2, axis=-1), (1, H)).astype(jnp.float32)
    sin_full = jnp.tile(jnp.repeat(sin_h, 2, axis=-1), (1, H)).astype(jnp.float32)

    attn1 = pallas_attention(norm_cat, norm_cat, params["attn1"], H,
                             rope=(cos_full, sin_full))           # bf16
    a_main = attn1[:, :S1]
    a_cond = attn1[:, S1:S1 + S2]
    a_kf = attn1[:, S1 + S2:]
    hidden = hidden + a_main * g_m
    hidden_cond = hidden_cond + a_cond * g_c
    hidden_kf = hidden_kf + a_kf * g_k

    # --- cross-attention on the main stream only (norm2 == Identity); residual fused ---
    hidden = pallas_attention(hidden, encoder, params["attn2"], H,
                              residual=hidden, out_dtype=jnp.float32)

    # --- FFN per stream: gate + residual fused into the second matmul epilogue ---
    fp = params["ffn"]

    def ffn(x, c_scale, c_shift, c_gate):
        n = layernorm_modulate(x, c_scale, c_shift)
        h = matmul_bias(n, fp["w1"], fp["b1"], activation="gelu",
                        out_dtype=jnp.bfloat16)
        return matmul_bias(h, fp["w2"], fp["b2"], gate=c_gate, residual=x,
                           out_dtype=jnp.float32)

    hidden = ffn(hidden, csc_m, csh_m, cg_m)
    hidden_cond = ffn(hidden_cond, csc_c, csh_c, cg_c)
    hidden_kf = ffn(hidden_kf, csc_k, csh_k, cg_k)
    return hidden, hidden_cond, hidden_kf


# ------------------------- pure-JAX reference (f32, HIGHEST) -------------------

_HI = jax.lax.Precision.HIGHEST


def _ref_lnmod(x, scale, shift, eps=EPS):
    mu = jnp.mean(x, axis=-1, keepdims=True)
    var = jnp.mean((x - mu) ** 2, axis=-1, keepdims=True)
    return (x - mu) * jax.lax.rsqrt(var + eps) * (1.0 + scale) + shift


def _ref_rms(x, w, eps=EPS):
    return x * jax.lax.rsqrt(jnp.mean(x * x, axis=-1, keepdims=True) + eps) * w


def _ref_rope(x, cos, sin):
    # x: [B, H, S, Dh]; cos/sin: [S, Dh//2]; interleaved (real, imag) pairs.
    xr = x[..., 0::2]
    xi = x[..., 1::2]
    return jnp.stack([xr * cos - xi * sin, xr * sin + xi * cos],
                     axis=-1).reshape(x.shape)


def _ref_attention(x, enc, p, H, rotary=None):
    B, Sq, D = x.shape
    Dh = D // H
    q = jnp.dot(x, p["wq"], precision=_HI) + p["bq"]
    k = jnp.dot(enc, p["wk"], precision=_HI) + p["bk"]
    v = jnp.dot(enc, p["wv"], precision=_HI) + p["bv"]
    q = _ref_rms(q, p["norm_q"])
    k = _ref_rms(k, p["norm_k"])

    def split(t):
        return t.reshape(B, -1, H, Dh).transpose(0, 2, 1, 3)

    q, k, v = split(q), split(k), split(v)
    if rotary is not None:
        cos, sin = rotary
        q = _ref_rope(q, cos, sin)
        k = _ref_rope(k, cos, sin)
    s = jnp.einsum("bhqd,bhkd->bhqk", q, k, precision=_HI) / math.sqrt(Dh)
    a = jax.nn.softmax(s, axis=-1)
    o = jnp.einsum("bhqk,bhkd->bhqd", a, v, precision=_HI)
    o = o.transpose(0, 2, 1, 3).reshape(B, Sq, D)
    return jnp.dot(o, p["wo"], precision=_HI) + p["bo"]


def wan_block_ref(params, hidden, encoder, temb, rotary,
                  temb_cond, hidden_cond, temb_kf, hidden_kf, num_heads):
    sst = params["scale_shift_table"]

    def chunk6(t):
        m = sst + t.astype(jnp.float32)
        return [m[:, i:i + 1, :] for i in range(6)]

    sh_m, sc_m, g_m, csh_m, csc_m, cg_m = chunk6(temb)
    sh_c, sc_c, g_c, csh_c, csc_c, cg_c = chunk6(temb_cond)
    sh_k, sc_k, g_k, csh_k, csc_k, cg_k = chunk6(temb_kf)

    n = jnp.concatenate([_ref_lnmod(hidden, sc_m, sh_m),
                         _ref_lnmod(hidden_cond, sc_c, sh_c),
                         _ref_lnmod(hidden_kf, sc_k, sh_k)], axis=1)
    a = _ref_attention(n, n, params["attn1"], num_heads, rotary)
    S1, S2 = hidden.shape[1], hidden_cond.shape[1]
    hidden = hidden + a[:, :S1] * g_m
    hidden_cond = hidden_cond + a[:, S1:S1 + S2] * g_c
    hidden_kf = hidden_kf + a[:, S1 + S2:] * g_k

    hidden = hidden + _ref_attention(hidden, encoder, params["attn2"], num_heads)

    fp = params["ffn"]

    def ffn(x):
        h = jax.nn.gelu(jnp.dot(x, fp["w1"], precision=_HI) + fp["b1"],
                        approximate=True)
        return jnp.dot(h, fp["w2"], precision=_HI) + fp["b2"]

    hidden = hidden + ffn(_ref_lnmod(hidden, csc_m, csh_m)) * cg_m
    hidden_cond = hidden_cond + ffn(_ref_lnmod(hidden_cond, csc_c, csh_c)) * cg_c
    hidden_kf = hidden_kf + ffn(_ref_lnmod(hidden_kf, csc_k, csh_k)) * cg_k
    return hidden, hidden_cond, hidden_kf


# ---------------------------------- main -------------------------------------

if __name__ == "__main__":
    B, D, F_DIM, H = 2, 32, 64, 4
    Dh = D // H
    S_main, S_cond, S_kf, S_enc = 8, 8, 8, 8
    S_total = S_main + S_cond + S_kf

    keys = iter(jax.random.split(jax.random.PRNGKey(0), 48))

    def rnd(shape, scale=0.02):
        return jax.random.normal(next(keys), shape, jnp.float32) * scale

    def attn_params():
        return {
            "wq": rnd((D, D)), "bq": rnd((D,)),
            "wk": rnd((D, D)), "bk": rnd((D,)),
            "wv": rnd((D, D)), "bv": rnd((D,)),
            "wo": rnd((D, D)), "bo": rnd((D,)),
            "norm_q": 1.0 + rnd((D,), 0.05),
            "norm_k": 1.0 + rnd((D,), 0.05),
        }

    params = {
        "scale_shift_table": rnd((1, 6, D), 1.0 / math.sqrt(D)),
        "attn1": attn_params(),
        "attn2": attn_params(),
        "ffn": {"w1": rnd((D, F_DIM)), "b1": rnd((F_DIM,)),
                "w2": rnd((F_DIM, D)), "b2": rnd((D,))},
    }

    hidden_states = rnd((B, S_main, D), 1.0)
    hidden_states_cond = rnd((B, S_cond, D), 1.0)
    hidden_states_keyframe = rnd((B, S_kf, D), 1.0)
    encoder_hidden_states = rnd((B, S_enc, D), 1.0)
    temb = rnd((B, 6, D), 1.0)
    temb_cond = rnd((B, 6, D), 1.0)
    temb_keyframe = rnd((B, 6, D), 1.0)

    # rotary table for the concatenated self-attention sequence
    # TODO(synk): torch computes the rotary complex product in float64; kept float32.
    pos = jnp.arange(S_total, dtype=jnp.float32)
    inv_freq = 1.0 / (10000.0 ** (jnp.arange(0, Dh, 2, dtype=jnp.float32) / Dh))
    ang = jnp.outer(pos, inv_freq)                      # [S_total, Dh//2]
    rotary = (jnp.cos(ang), jnp.sin(ang))

    args = (params, hidden_states, encoder_hidden_states, temb, rotary,
            temb_cond, hidden_states_cond, temb_keyframe, hidden_states_keyframe, H)

    out = jax.block_until_ready(wan_block_pallas(*args))
    ref = jax.block_until_ready(wan_block_ref(*args))

    for o, r in zip(out, ref):
        assert o.shape == r.shape and o.dtype == jnp.float32
        if not bool(jnp.allclose(o, r, atol=2e-2, rtol=2e-2)):
            err = float(jnp.max(jnp.abs(o - r)))
            raise AssertionError(
                f"Pallas output does not match JAX reference (max abs err {err:.3e})")

    print("KERNEL_OK")
</pallas_src>

<mosaic_0001>
module attributes {stable_mosaic.version = 11 : i64} {
  func.func @_ln_mod_kernel(%arg0: i32, %arg1: i32, %arg2: memref<1x8x32xf32, #tpu.memory_space<vmem>>, %arg3: memref<1x1x32xf32, #tpu.memory_space<vmem>>, %arg4: memref<1x1x32xf32, #tpu.memory_space<vmem>>, %arg5: memref<1x8x32xbf16, #tpu.memory_space<vmem>>) attributes {dimension_semantics = [#tpu.dimension_semantics<parallel>, #tpu.dimension_semantics<parallel>], iteration_bounds = array<i64: 2, 1>, scalar_prefetch = 0 : i64, scratch_operands = 0 : i64, tpu.core_type = #tpu.core_type<tc>, window_params = [{transform_indices = @transform_0, window_bounds = array<i64: 1, 8, 32>}, {transform_indices = @transform_1, window_bounds = array<i64: 1, 1, 32>}, {transform_indices = @transform_2, window_bounds = array<i64: 1, 1, 32>}, {transform_indices = @transform_3, window_bounds = array<i64: 1, 8, 32>}]} {
    %c0 = arith.constant 0 : index
    %c0_0 = arith.constant 0 : index
    %c0_1 = arith.constant 0 : index
    %0 = vector.load %arg2[%c0, %c0_0, %c0_1] : memref<1x8x32xf32, #tpu.memory_space<vmem>>, vector<1x8x32xf32>
    %1 = vector.shape_cast %0 : vector<1x8x32xf32> to vector<8x32xf32>
    %cst = arith.constant dense<0.000000e+00> : vector<8xf32>
    %2 = vector.multi_reduction <add>, %1, %cst [1] : vector<8x32xf32> to vector<8xf32>
    %3 = vector.shape_cast %2 : vector<8xf32> to vector<8x1xf32>
    %cst_2 = arith.constant 3.200000e+01 : f32
    %4 = vector.broadcast %cst_2 : f32 to vector<8x1xf32>
    %5 = arith.divf %3, %4 : vector<8x1xf32>
    %6 = vector.broadcast %5 : vector<8x1xf32> to vector<8x32xf32>
    %7 = arith.subf %1, %6 : vector<8x32xf32>
    %8 = arith.mulf %7, %7 : vector<8x32xf32>
    %cst_3 = arith.constant dense<0.000000e+00> : vector<8xf32>
    %9 = vector.multi_reduction <add>, %8, %cst_3 [1] : vector<8x32xf32> to vector<8xf32>
    %10 = vector.shape_cast %9 : vector<8xf32> to vector<8x1xf32>
    %cst_4 = arith.constant 3.200000e+01 : f32
    %11 = vector.broadcast %cst_4 : f32 to vector<8x1xf32>
    %12 = arith.divf %10, %11 : vector<8x1xf32>
    %cst_5 = arith.constant 9.99999997E-7 : f32
    %13 = vector.broadcast %cst_5 : f32 to vector<8x1xf32>
    %14 = arith.addf %12, %13 : vector<8x1xf32>
    %15 = math.rsqrt %14 : vector<8x1xf32>
    %16 = vector.broadcast %15 : vector<8x1xf32> to vector<8x32xf32>
    %17 = arith.mulf %7, %16 : vector<8x32xf32>
    %c0_6 = arith.constant 0 : index
    %c0_7 = arith.constant 0 : index
    %c0_8 = arith.constant 0 : index
    %18 = vector.load %arg3[%c0_6, %c0_7, %c0_8] : memref<1x1x32xf32, #tpu.memory_space<vmem>>, vector<1x1x32xf32>
    %19 = vector.shape_cast %18 : vector<1x1x32xf32> to vector<1x32xf32>
    %cst_9 = arith.constant 1.000000e+00 : f32
    %20 = vector.broadcast %cst_9 : f32 to vector<1x32xf32>
    %21 = arith.addf %20, %19 : vector<1x32xf32>
    %22 = vector.broadcast %21 : vector<1x32xf32> to vector<8x32xf32>
    %23 = arith.mulf %17, %22 : vector<8x32xf32>
    %c0_10 = arith.constant 0 : index
    %c0_11 = arith.constant 0 : index
    %c0_12 = arith.constant 0 : index
    %24 = vector.load %arg4[%c0_10, %c0_11, %c0_12] : memref<1x1x32xf32, #tpu.memory_space<vmem>>, vector<1x1x32xf32>
    %25 = vector.shape_cast %24 : vector<1x1x32xf32> to vector<1x32xf32>
    %26 = vector.broadcast %25 : vector<1x32xf32> to vector<8x32xf32>
    %27 = arith.addf %23, %26 : vector<8x32xf32>
    %28 = arith.truncf %27 : vector<8x32xf32> to vector<8x32xbf16>
    %c0_13 = arith.constant 0 : index
    %c0_14 = arith.constant 0 : index
    %c0_15 = arith.constant 0 : index
    %29 = vector.load %arg5[%c0_13, %c0_14, %c0_15] : memref<1x8x32xbf16, #tpu.memory_space<vmem>>, vector<1x8x32xbf16>
    %30 = vector.shape_cast %29 : vector<1x8x32xbf16> to vector<8x32xbf16>
    %31 = vector.shape_cast %28 : vector<8x32xbf16> to vector<1x8x32xbf16>
    tpu.vector_store %arg5[%c0_13, %c0_14, %c0_15], %31 {strides = array<i32>} : memref<1x8x32xbf16, #tpu.memory_space<vmem>>, vector<1x8x32xbf16>,
    return
  }
  func.func @transform_0(%arg0: i32, %arg1: i32) -> (i32, i32, i32) {
    %c0_i32 = arith.constant 0 : i32
    %c0_i32_0 = arith.constant 0 : i32
    return %arg0, %arg1, %c0_i32 : i32, i32, i32
  }
  func.func @transform_1(%arg0: i32, %arg1: i32) -> (i32, i32, i32) {
    %c0_i32 = arith.constant 0 : i32
    %c0_i32_0 = arith.constant 0 : i32
    %c0_i32_1 = arith.constant 0 : i32
    return %arg0, %c0_i32, %c0_i32_0 : i32, i32, i32
  }
  func.func @transform_2(%arg0: i32, %arg1: i32) -> (i32, i32, i32) {
    %c0_i32 = arith.constant 0 : i32
    %c0_i32_0 = arith.constant 0 : i32
    %c0_i32_1 = arith.constant 0 : i32
    return %arg0, %c0_i32, %c0_i32_0 : i32, i32, i32
  }
  func.func @transform_3(%arg0: i32, %arg1: i32) -> (i32, i32, i32) {
    %c0_i32 = arith.constant 0 : i32
    %c0_i32_0 = arith.constant 0 : i32
    return %arg0, %arg1, %c0_i32 : i32, i32, i32
  }
}

</mosaic_0001>

<bundles_post_ra>
// kernel: tpu_custom_call.1
= control target key start
LH: loop header
LB: loop body
LE: loop exit
PB: predicated region body
PF: predicated region fallthrough
CT: control target
= control target key end

     0   :  { %8 = vsyncpa [#allocation3], 0  ;;  %s830_s0 = inlined_call_operand.hbm [shape: f32[2,8,32], index: 0, kind: input, shape index: {}]   ;;  %s831_s1 = inlined_call_operand.hbm [shape: f32[2,1,32], index: 1, kind: input, shape index: {}]   ;;  %s832_s2 = inlined_call_operand.vmem [shape: f32[2,1,32], index: 2, kind: input, shape index: {}]   ;;  %s833_s3 = inlined_call_operand.hbm [shape: bf16[2,8,32], index: 3, kind: output, shape index: {}]  }
   0x1   :  { %10 = vsyncpa [#allocation3 + $0x1], 0 }
   0x2   :  { %11 = vsyncpa [#allocation6], 0 }
   0x3   :  { %13 = vsyncpa [#allocation6 + $0x1], 0 }
   0x4   :  { %14 = vsyncpa [#allocation4], 0 }
   0x5   :  { %16 = vsyncpa [#allocation4 + $0x1], 0  ;;  %s660_s12 = smov 0   ;;  %s662_s13 = smov 0  }
   0x6   :  { %s664_s14 = smov 0   ;;  %s666_s15 = smov 0  }
   0x7   :  { %s668_s16 = smov 0   ;;  %s670_s17 = smov 0  }
   0x8 LB: > { %s411_s18 = sadd.s32 4294967295, %s635_s17   ;;  %s412_s19 = sadd.s32 4294967294, %s635_s17   ;;  %s635_s17 = sphi %s670_s17, %s22_s17   ;;  %s631_s16 = sphi %s668_s16, %s845_s16   ;;  %s627_s15 = sphi %s666_s15, %s844_s15   ;;  %s623_s14 = sphi %s664_s14, %s843_s14   ;;  %s619_s13 = sphi %s662_s13, %s842_s13   ;;  %s615_s12 = sphi %s660_s12, %s841_s12  }
   0x9   : > { %s34_s20 = sadd.s32 1, %s631_s16  ;;  %s43_s21 = sadd.s32 1, %s623_s14 }
   0xa   : > { %p36_p0 = scmp.ge.s32.totalorder %s34_s20, 2  ;;  %p50_p1 = scmp.ne.s32.totalorder %s623_s14, %s619_s13 }
   0xb   : > { %p51_p2 = scmp.eq.s32.totalorder %s635_s17, 0  ;;  %p56_p3 = scmp.ne.s32.totalorder %s619_s13, %s615_s12 }
   0xc   : > { %s847_s20 = smov (%p36_p0, %s34_s20), 0  ;;  %p57_p5 = scmp.eq.s32.totalorder %s411_s18, 0 }
   0xd   : > { %p701_p4 = por %p51_p2, %p50_p1  ;;  %s38_s23 = ssub.s32 %s631_s16, %s847_s20 }
   0xe   : > { %p134_p6 = scmp.eq.s32.totalorder %s411_s18, 1  ;;  %p41_p7 = scmp.eq.s32.totalorder %s38_s23, 0 }
   0xf   : > { %p707_p8 = por %p57_p5, %p56_p3  ;;  %p140_p10 = scmp.eq.s32.totalorder %s412_s19, 1 }
  0x10   : > { %p711_p9 = por %p134_p6, %p50_p1  ;;  %p443_p13 = scmp.lt.s32.totalorder %s635_s17, 2 }
  0x11   : > { %s716_s26 = scalar_select %p41_p7, %s623_s14, %s43_s21  }
  0x12   : > { %p718_p11 = por %p140_p10, %p56_p3  ;;  %s725_s28 = sand.u32 1, %s623_s14  }
  0x13   : > { %s415_s29 = sshll.u32 %s725_s28, 3  ;;  %s416_s30 = sshll.u32 %s631_s16, 7 }
  0x14   : > { %s170_s6 = scalar_lea.hbm %s830_s0, %s416_s30  ;;  %s164_s7 = scalar_lea.vmem [#allocation2], %s415_s29 }
  0x15   : > { %s172_s8 = sshll.u32 %s164_s7, 4  ;;  %p734_p0 = pnand %p443_p13, %p701_p4  ;;  %s173_s8 = int_to_ptr.vmem [resolvable:$true] %s172_s8 }
  0x16   : > { %p418_p1 = scmp.ge.s32.totalorder %s635_s17, 1  ;;  %p200_p2 = scmp.lt.s32.totalorder %s635_s17, 3 }
  0x17   : > { %s161_s10 = scalar_lea.sflag [#allocation3], %s725_s28  ;;  %p497_p3 = pneg %p734_p0 }
  0x18   : > { %s508_s11 = scalar_lea.vmem %s173_s8, 128  ;;  %s637_s18 = smov [#allocation2]  }
  0x19   : > { %p509_p5 = scmp.ne.s32.totalorder %s173_s8, %s508_s11  ;;  %s513_s19 = sshll.u32 %s637_s18, 4  ;;  %s514_s19 = int_to_ptr.vmem [resolvable:$false] %s513_s19 }
  0x1a   : > { %s515_s21 = scalar_lea.vmem %s514_s19, 256  ;;  %p516_p4 = scmp.lt.s32.totalorder %s173_s8, %s514_s19 }
  0x1b   : > { %p511_p6 = pnand %p509_p5, %p497_p3  ;;  %p517_p10 = scmp.lt.s32.totalorder %s515_s21, %s508_s11 }
  0x1d   : > { %p512_p7 = pneg %p511_p6  ;;  %p518_p13 = por %p517_p10, %p516_p4 }
  0x1f   : > { %p519_p12 = pnand %p518_p13, %p512_p7 }
  0x21   : > { %522 = shalt.err (!%p519_p12)
}
  0x22   : > { %435 = dma.hbm_to_vmem [thread:$0]  (!%p734_p0), %s170_s6, 128, %s173_s8, %s161_s10  }
  0x23   : > { %p752_p5 = pnand %p418_p1, %p200_p2  ;;  %s417_s23 = sshll.u32 %s631_s16, 4 }
  0x24   : > { %s182_s29 = scalar_lea.vmem [#allocation5], %s725_s28  ;;  %s187_s7 = scalar_lea.hbm %s831_s1, %s417_s23 }
  0x25   : > { %s189_s30 = sshll.u32 %s182_s29, 4  ;;  %s180_s11 = scalar_lea.sflag [#allocation6], %s725_s28  ;;  %s190_s30 = int_to_ptr.vmem [resolvable:$true] %s189_s30 }
  0x26   : > { %s536_s18 = scalar_lea.vmem %s190_s30, 16  ;;  %s638_s6 = smov [#allocation5]  }
  0x27   : > { %p537_p12 = scmp.ne.s32.totalorder %s190_s30, %s536_s18  ;;  %s541_s8 = sshll.u32 %s638_s6, 4  ;;  %s542_s8 = int_to_ptr.vmem [resolvable:$false] %s541_s8 }
  0x28   : > { %s543_s10 = scalar_lea.vmem %s542_s8, 32  ;;  %p544_p1 = scmp.lt.s32.totalorder %s190_s30, %s542_s8 }
  0x29   : > { %p539_p6 = pnand %p537_p12, %p497_p3  ;;  %p545_p2 = scmp.lt.s32.totalorder %s543_s10, %s536_s18 }
  0x2b   : > { %p540_p7 = pneg %p539_p6  ;;  %p546_p4 = por %p545_p2, %p544_p1 }
  0x2d   : > { %p547_p10 = pnand %p546_p4, %p540_p7 }
  0x2f   : > { %550 = shalt.err (!%p547_p10)
}
  0x30   : > { %438 = dma.hbm_to_vmem [thread:$0]  (!%p734_p0), %s187_s7, 16, %s190_s30, %s180_s11  }
  0x31   : > { %204 = sbr.rel (%p752_p5) target bundleno = 381 (0x17d), region = 32  ;;  %s770_s28 = sand.u32 (!%p752_p5), 1, %s619_s13  }
  0x32   : > { %s419_s19 = sshll.u32 (!%p752_p5), %s770_s28, 3  ;;  %s207_s21 = scalar_lea.sflag (!%p752_p5), [#allocation3], %s770_s28 }
  0x33   : > { %s210_s23 = scalar_lea.vmem (!%p752_p5), [#allocation2], %s419_s19 }
  0x36   : > { %602 = dma.done.wait (%p707_p8), %s207_s21, 128  }
  0x37   : > { %604 = vsyncadd (%p707_p8), %s207_s21, 4294967168  ;;  %s216_s9 = scalar_lea.sflag [#allocation6], %s770_s28  ;;  %s218_s22 = scalar_lea.vmem [#allocation5], %s770_s28 }
  0x38   : > { %606 = dma.done.wait (%p707_p8), %s216_s9, 16  }
  0x39   : > { %608 = vsyncadd (%p707_p8), %s216_s9, 4294967280  ;;  %vm252_vm0 = vcmask 261120   ;;  %v251_v0 = vld [vmem:[%s210_s23] sm:$0xff]  ;;  %v270_v10 = vlaneseq  ;;  %p248_p8 = scmp.lt.s32.totalorder %s627_s15, 1  ;;  %s420_s29 = sshll.u32 %s770_s28, 2  ;;  %vm285_vm1 = vcmask 257024  }
  0x3a   : > { %v253_v1 = vsel %vm252_vm0, %v251_v0, 0.0  ;;  %v267_v12 = vld [vmem:[%s218_s22] sm:$0x1]  ;;  %s423_s7 = sshll.u32 %s627_s15, 6  ;;  %s247_s11 = scalar_lea.vmem [#allocation7], %s420_s29 }
  0x3b   : > { %254 = vadd.xlane.f32.xlu0 %v253_v1  ;;  %v271_v11 = vshrl.u32 %v270_v10, 7  ;;  %s249_s24 = scalar_select %p248_p8, %s627_s15, 1  ;;  %v268_v13 = vadd.f32 1.0, %v267_v12 }
  0x3c   : > { %s302_s18 = sshll.u32 %s247_s11, 4  ;;  %s300_s10 = scalar_lea.hbm %s833_s3, %s423_s7  ;;  %s303_s18 = int_to_ptr.vmem [resolvable:$true] %s302_s18 }
  0x3d   : > { %v272_v14 = vsub.s32 0, %v271_v11  ;;  %s250_s5 = scalar_lea.vmem %s832_s2, %s249_s24  ;;  %s288_s19 = scalar_lea.sflag [#allocation4], %s770_s28 }
  0x3e   : > { %v421_v18 = vld [vmem:[%s250_s5] ss:$0 sm:$0xff]  ;;  %s551_s21 = scalar_lea.vmem %s303_s18, 64  ;;  %s639_s23 = smov [#allocation7]  }
  0x3f   : > { %v273_v15 = vrot.slane %v268_v13, %v272_v14  ;;  %p552_p0 = scmp.ne.s32.totalorder %s303_s18, %s551_s21  ;;  %s555_s9 = sshll.u32 %s639_s23, 4  ;;  %s556_s9 = int_to_ptr.vmem [resolvable:$false] %s555_s9 }
  0x40   : > { %s557_s15 = scalar_lea.vmem %s556_s9, 128  ;;  %p558_p5 = scmp.lt.s32.totalorder %s303_s18, %s556_s9 }
  0x41   : > { %p553_p3 = pnand %p552_p0, %p711_p9  ;;  %p559_p12 = scmp.lt.s32.totalorder %s557_s15, %s551_s21 }
  0x43   : > { %p554_p13 = pneg %p553_p3  ;;  %p560_p6 = por %p559_p12, %p558_p5 }
  0x45   : > { %p561_p7 = pnand %p560_p6, %p554_p13 }
  0xc4   : > { %v255_v2 = vpop.xlane.xlu0 %254 }
  0xc5   : > { %v257_v3 = vmul.f32 0.03125, %v255_v2 }
  0xc7   : > { %v258_v4 = vsub.f32 %v251_v0, %v257_v3 }
  0xc9   : > { %v259_v5 = vmul.f32 %v258_v4, %v258_v4 }
  0xcb   : > { %v260_v6 = vsel %vm252_vm0, %v259_v5, 0.0 }
  0xcc   : > { %261 = vadd.xlane.f32.xlu0 %v260_v6 }
 0x155   : > { %v262_v7 = vpop.xlane.xlu0 %261 }
 0x156   : > { %v263_v8 = vmul.f32 0.03125, %v262_v7 }
 0x158   : > { %v264_v9 = vadd.f32 1e-06, %v263_v8 }
 0x15a   : > { %493 = vrsqrt.f32 %v264_v9 }
 0x167   : > { %v494_v16 = vpop.eup %493 }
 0x168   : > { %v266_v17 = vmul.f32 %v494_v16, %v258_v4 }
 0x16a   : > { %v275_v19 = vmul.f32 %v273_v15, %v266_v17 }
 0x16c   : > { %v283_v20 = vadd.f32 %v421_v18, %v275_v19 }
 0x16e   : > { %v284_v21 = vpack.c.bf16 %v283_v20, %v283_v20 }
 0x170   : > { %286 = vst.msk [vmem:[%s247_s11] sm:$0xf] %vm285_vm1, %v284_v21 }
 0x171   : > { %564 = shalt.err (!%p561_p7)
}
 0x172   : > { %s565_s22 = scalar_lea.hbm %s300_s10, 64  ;;  %s569_s29 = scalar_lea.hbm %s833_s3, 128 }
 0x173   : > { %p566_p1 = scmp.ne.s32.totalorder %s300_s10, %s565_s22  ;;  %p570_p10 = scmp.lt.s32.totalorder %s300_s10, %s833_s3 }
 0x174   : > { %p571_p8 = scmp.lt.s32.totalorder %s569_s29, %s565_s22 }
 0x175   : > { %p567_p2 = pnand %p566_p1, %p711_p9 }
 0x176   : > { %p572_p0 = por %p571_p8, %p570_p10 }
 0x177   : > { %p568_p4 = pneg %p567_p2 }
 0x179   : > { %p573_p3 = pnand %p572_p0, %p568_p4 }
 0x17b   : > { %576 = shalt.err (!%p573_p3)
}
 0x17c   : > { %430 = dma.vmem_to_hbm [thread:$0]  (%p711_p9), %s303_s18, 64, %s300_s10, %s288_s19  }
 0x17d PF: > { %s314_s5 = sand.u32 1, %s615_s12   ;;  %p840_p13 = scmp.ge.s32.totalorder %s635_s17, 2 }
 0x17e   : > { %s315_s7 = scalar_lea.sflag [#allocation4], %s314_s5 }
 0x17f   : > { %p440_p5 = pnand %p840_p13, %p718_p11 }
 0x181   : > { %p441_p12 = pneg %p440_p5 }
 0x183   : > { %610 = dma.done.wait (%p441_p12), %s315_s7, 64  }
 0x184   : > { %612 = vsyncadd (%p441_p12), %s315_s7, 4294967232  ;;  %s22_s17 = sadd.s32 1, %s635_s17   ;;  %s841_s12 = smov %s619_s13 }
 0x185   : > { %p19_p6 = scmp.ge.s32.totalorder %s22_s17, 4   ;;  %s842_s13 = smov %s623_s14 }
 0x186   : > { %s843_s14 = smov %s716_s26  ;;  %s844_s15 = smov %s631_s16 }
 0x187   : > { %s845_s16 = smov %s847_s20  ;;  %21 = sbr.rel (!%p19_p6) target bundleno = 8 (0x8), region = 93 }
 0x18c   :  { %320 = vsyncpa [#allocation3], 1 }
 0x18d   :  { %322 = vsyncpa [#allocation3 + $0x1], 1 }
 0x18e   :  { %323 = vsyncpa [#allocation6], 1 }
 0x18f   :  { %325 = vsyncpa [#allocation6 + $0x1], 1 }
 0x190   :  { %326 = vsyncpa [#allocation4], 1 }
 0x191   :  { %328 = vsyncpa [#allocation4 + $0x1], 1 }

</bundles_post_ra>
